<compile_context>
chip_gen: v7x
topology: tpu7x:2x2x1
jax: 0.10.0
libtpu: 0.0.40
codegen_flags: <defaults>
</compile_context>

<pallas_src>
import functools
import math

import jax
import jax.numpy as jnp
import numpy as np
from jax import lax
from jax.experimental import pallas as pl
from jax.experimental.pallas import tpu as pltpu


def _gaussian_window_np(window_size: int, sigma: float = 1.5) -> np.ndarray:
    """Same construction as create_window(): normalized 1-D Gaussian, outer product."""
    g = np.array(
        [math.exp(-((x - window_size // 2) ** 2) / (2.0 * sigma ** 2))
         for x in range(window_size)],
        dtype=np.float32,
    )
    g = g / g.sum()
    return np.outer(g, g).astype(np.float32)  # (ws, ws); identical per channel


def _conv_matrix_np(H: int, W: int, ws: int) -> np.ndarray:
    """Dense matrix M of shape (H*W, Ho*Wo) with vec(VALID_conv(X, win)) = vec(X) @ M."""
    win = _gaussian_window_np(ws)
    Ho, Wo = H - ws + 1, W - ws + 1
    M = np.zeros((H * W, Ho * Wo), np.float32)
    for ho in range(Ho):
        for wo in range(Wo):
            col = ho * Wo + wo
            for i in range(ws):
                for j in range(ws):
                    M[(ho + i) * W + (wo + j), col] = win[i, j]
    return M


def _ssim_kernel(img1_ref, img2_ref, mat_ref, out_ref, *, nc, n_out):
    x1 = img1_ref[...]   # (N*C, H*W) float32, lane-dense
    x2 = img2_ref[...]
    M = mat_ref[...]     # (H*W, Ho*Wo) float32 conv matrix

    # val_range=None branch of the reference: data-dependent dynamic range L.
    max_val = jnp.where(jnp.max(x1) > 128.0, 255.0, 1.0)
    min_val = jnp.where(jnp.min(x1) < -0.5, -1.0, 0.0)
    L = max_val - min_val
    C1 = (0.01 * L) ** 2
    C2 = (0.03 * L) ** 2

    # All five depthwise Gaussian convolutions of all images as ONE MXU matmul.
    streams = jnp.concatenate([x1, x2, x1 * x1, x2 * x2, x1 * x2], axis=0)  # (5*NC, H*W)
    conv = jnp.dot(streams, M, preferred_element_type=jnp.float32)          # (5*NC, Ho*Wo)

    mu1 = conv[0 * nc:1 * nc]
    mu2 = conv[1 * nc:2 * nc]
    s11 = conv[2 * nc:3 * nc]
    s22 = conv[3 * nc:4 * nc]
    s12 = conv[4 * nc:5 * nc]

    mu1_sq = mu1 * mu1
    mu2_sq = mu2 * mu2
    mu1_mu2 = mu1 * mu2
    sigma1_sq = s11 - mu1_sq
    sigma2_sq = s22 - mu2_sq
    sigma12 = s12 - mu1_mu2

    v1 = 2.0 * sigma12 + C2
    v2 = sigma1_sq + sigma2_sq + C2
    ssim_map = (2.0 * mu1_mu2 + C1) * v1 / ((mu1_sq + mu2_sq + C1) * v2)

    # size_average=True -> global mean (scalar).
    mean_val = jnp.sum(ssim_map) * (1.0 / float(nc * n_out))
    out_ref[...] = jnp.broadcast_to(mean_val, (1, 1))


def ssim_pallas(img1, img2, window_size: int = 11):
    N, C, H, W = img1.shape
    ws = min(window_size, H, W)          # real_size logic from ssim()
    Ho, Wo = H - ws + 1, W - ws + 1
    conv_mat = jnp.asarray(_conv_matrix_np(H, W, ws))

    # Lane-dense presentation: (N*C, H*W); reshape is a free XLA bitcast on contiguous data.
    x1 = img1.astype(jnp.float32).reshape(N * C, H * W)
    x2 = img2.astype(jnp.float32).reshape(N * C, H * W)

    out = pl.pallas_call(
        functools.partial(_ssim_kernel, nc=N * C, n_out=Ho * Wo),
        out_shape=jax.ShapeDtypeStruct((1, 1), jnp.float32),
        in_specs=[
            pl.BlockSpec(memory_space=pltpu.MemorySpace.VMEM),
            pl.BlockSpec(memory_space=pltpu.MemorySpace.VMEM),
            pl.BlockSpec(memory_space=pltpu.MemorySpace.VMEM),
        ],
        out_specs=pl.BlockSpec(memory_space=pltpu.MemorySpace.VMEM),
    )(x1, x2, conv_mat)
    return out[0, 0]


def ssim_reference(img1, img2, window_size: int = 11):
    """Pure-JAX reference mirroring the PyTorch ssim() (size_average=True, full=False)."""
    N, C, H, W = img1.shape
    ws = min(window_size, H, W)
    win = jnp.asarray(_gaussian_window_np(ws))
    kernel = jnp.broadcast_to(win[None, None], (C, 1, ws, ws))

    def conv(x):
        return lax.conv_general_dilated(
            x, kernel, window_strides=(1, 1), padding="VALID",
            dimension_numbers=("NCHW", "OIHW", "NCHW"), feature_group_count=C)

    max_val = jnp.where(jnp.max(img1) > 128.0, 255.0, 1.0)
    min_val = jnp.where(jnp.min(img1) < -0.5, -1.0, 0.0)
    L = max_val - min_val
    C1 = (0.01 * L) ** 2
    C2 = (0.03 * L) ** 2

    mu1, mu2 = conv(img1), conv(img2)
    mu1_sq, mu2_sq, mu1_mu2 = mu1 * mu1, mu2 * mu2, mu1 * mu2
    sigma1_sq = conv(img1 * img1) - mu1_sq
    sigma2_sq = conv(img2 * img2) - mu2_sq
    sigma12 = conv(img1 * img2) - mu1_mu2
    v1 = 2.0 * sigma12 + C2
    v2 = sigma1_sq + sigma2_sq + C2
    ssim_map = (2.0 * mu1_mu2 + C1) * v1 / ((mu1_sq + mu2_sq + C1) * v2)
    return jnp.mean(ssim_map)


if __name__ == "__main__":
    key = jax.random.PRNGKey(0)
    k1, k2 = jax.random.split(key)
    shape = (2, 4, 16, 16)  # N, C, H, W
    img1 = jax.random.uniform(k1, shape, dtype=jnp.float32)
    img2 = jnp.clip(
        img1 + 0.05 * jax.random.normal(k2, shape, dtype=jnp.float32), 0.0, 1.0
    )

    out = ssim_pallas(img1, img2)
    jax.block_until_ready(out)

    ref = ssim_reference(img1, img2)
    assert np.allclose(np.asarray(out), np.asarray(ref), rtol=1e-4, atol=1e-5), (
        float(out), float(ref))

    print("KERNEL_OK")
</pallas_src>

<mosaic_0001>
module attributes {stable_mosaic.version = 11 : i64} {
  func.func @_ssim_kernel(%arg0: memref<8x256xf32, #tpu.memory_space<vmem>>, %arg1: memref<8x256xf32, #tpu.memory_space<vmem>>, %arg2: memref<256x36xf32, #tpu.memory_space<vmem>>, %arg3: memref<1x1xf32, #tpu.memory_space<vmem>>) attributes {dimension_semantics = [], scalar_prefetch = 0 : i64, scratch_operands = 0 : i64, tpu.core_type = #tpu.core_type<tc>} {
    %c0 = arith.constant 0 : index
    %c0_0 = arith.constant 0 : index
    %0 = vector.load %arg0[%c0, %c0_0] : memref<8x256xf32, #tpu.memory_space<vmem>>, vector<8x256xf32>
    %c0_1 = arith.constant 0 : index
    %c0_2 = arith.constant 0 : index
    %1 = vector.load %arg1[%c0_1, %c0_2] : memref<8x256xf32, #tpu.memory_space<vmem>>, vector<8x256xf32>
    %c0_3 = arith.constant 0 : index
    %c0_4 = arith.constant 0 : index
    %2 = vector.load %arg2[%c0_3, %c0_4] : memref<256x36xf32, #tpu.memory_space<vmem>>, vector<256x36xf32>
    %3 = vector.shape_cast %0 : vector<8x256xf32> to vector<1x8x256xf32>
    %cst = arith.constant dense<0xFF800000> : vector<1xf32>
    %4 = vector.multi_reduction <maximumf>, %3, %cst [1, 2] : vector<1x8x256xf32> to vector<1xf32>
    %5 = vector.shape_cast %4 : vector<1xf32> to vector<1x1x1xf32>
    %6 = vector.extract %5[0, 0, 0] : f32 from vector<1x1x1xf32>
    %cst_5 = arith.constant 1.280000e+02 : f32
    %7 = arith.cmpf ogt, %6, %cst_5 : f32
    %cst_6 = arith.constant 2.550000e+02 : f32
    %cst_7 = arith.constant 1.000000e+00 : f32
    %8 = arith.select %7, %cst_6, %cst_7 : f32
    %9 = vector.shape_cast %0 : vector<8x256xf32> to vector<1x8x256xf32>
    %cst_8 = arith.constant dense<0x7F800000> : vector<1xf32>
    %10 = vector.multi_reduction <minimumf>, %9, %cst_8 [1, 2] : vector<1x8x256xf32> to vector<1xf32>
    %11 = vector.shape_cast %10 : vector<1xf32> to vector<1x1x1xf32>
    %12 = vector.extract %11[0, 0, 0] : f32 from vector<1x1x1xf32>
    %cst_9 = arith.constant -5.000000e-01 : f32
    %13 = arith.cmpf olt, %12, %cst_9 : f32
    %cst_10 = arith.constant -1.000000e+00 : f32
    %cst_11 = arith.constant 0.000000e+00 : f32
    %14 = arith.select %13, %cst_10, %cst_11 : f32
    %15 = arith.subf %8, %14 : f32
    %cst_12 = arith.constant 0.00999999977 : f32
    %16 = arith.mulf %cst_12, %15 : f32
    %17 = arith.mulf %16, %16 : f32
    %cst_13 = arith.constant 3.000000e-02 : f32
    %18 = arith.mulf %cst_13, %15 : f32
    %19 = arith.mulf %18, %18 : f32
    %20 = arith.mulf %0, %0 : vector<8x256xf32>
    %21 = arith.mulf %1, %1 : vector<8x256xf32>
    %22 = arith.mulf %0, %1 : vector<8x256xf32>
    %23 = tpu.concatenate %0, %1, %20, %21, %22 in 0 : vector<8x256xf32>, vector<8x256xf32>, vector<8x256xf32>, vector<8x256xf32>, vector<8x256xf32> -> vector<40x256xf32>
    %cst_14 = arith.constant dense<0.000000e+00> : vector<40x36xf32>
    %24 = tpu.matmul %23, %2, %cst_14 {dimension_numbers = #tpu.dot_dimension_numbers<[1], [0], [0], [1], [0, 0, 1, 1], [], []>} : vector<40x256xf32>, vector<256x36xf32>, vector<40x36xf32> -> vector<40x36xf32>
    %25 = vector.extract_strided_slice %24 {offsets = [0, 0], sizes = [8, 36], strides = [1, 1]} : vector<40x36xf32> to vector<8x36xf32>
    %26 = vector.extract_strided_slice %24 {offsets = [8, 0], sizes = [8, 36], strides = [1, 1]} : vector<40x36xf32> to vector<8x36xf32>
    %27 = vector.extract_strided_slice %24 {offsets = [16, 0], sizes = [8, 36], strides = [1, 1]} : vector<40x36xf32> to vector<8x36xf32>
    %28 = vector.extract_strided_slice %24 {offsets = [24, 0], sizes = [8, 36], strides = [1, 1]} : vector<40x36xf32> to vector<8x36xf32>
    %29 = vector.extract_strided_slice %24 {offsets = [32, 0], sizes = [8, 36], strides = [1, 1]} : vector<40x36xf32> to vector<8x36xf32>
    %30 = arith.mulf %25, %25 : vector<8x36xf32>
    %31 = arith.mulf %26, %26 : vector<8x36xf32>
    %32 = arith.mulf %25, %26 : vector<8x36xf32>
    %33 = arith.subf %27, %30 : vector<8x36xf32>
    %34 = arith.subf %28, %31 : vector<8x36xf32>
    %35 = arith.subf %29, %32 : vector<8x36xf32>
    %cst_15 = arith.constant 2.000000e+00 : f32
    %36 = vector.broadcast %cst_15 : f32 to vector<8x36xf32>
    %37 = arith.mulf %36, %35 : vector<8x36xf32>
    %38 = vector.broadcast %19 : f32 to vector<8x36xf32>
    %39 = arith.addf %37, %38 : vector<8x36xf32>
    %40 = arith.addf %33, %34 : vector<8x36xf32>
    %41 = vector.broadcast %19 : f32 to vector<8x36xf32>
    %42 = arith.addf %40, %41 : vector<8x36xf32>
    %cst_16 = arith.constant 2.000000e+00 : f32
    %43 = vector.broadcast %cst_16 : f32 to vector<8x36xf32>
    %44 = arith.mulf %43, %32 : vector<8x36xf32>
    %45 = vector.broadcast %17 : f32 to vector<8x36xf32>
    %46 = arith.addf %44, %45 : vector<8x36xf32>
    %47 = arith.mulf %46, %39 : vector<8x36xf32>
    %48 = arith.addf %30, %31 : vector<8x36xf32>
    %49 = vector.broadcast %17 : f32 to vector<8x36xf32>
    %50 = arith.addf %48, %49 : vector<8x36xf32>
    %51 = arith.mulf %50, %42 : vector<8x36xf32>
    %52 = arith.divf %47, %51 : vector<8x36xf32>
    %53 = vector.shape_cast %52 : vector<8x36xf32> to vector<1x8x36xf32>
    %cst_17 = arith.constant dense<0.000000e+00> : vector<1xf32>
    %54 = vector.multi_reduction <add>, %53, %cst_17 [1, 2] : vector<1x8x36xf32> to vector<1xf32>
    %55 = vector.shape_cast %54 : vector<1xf32> to vector<1x1x1xf32>
    %56 = vector.extract %55[0, 0, 0] : f32 from vector<1x1x1xf32>
    %cst_18 = arith.constant 0.00347222225 : f32
    %57 = arith.mulf %56, %cst_18 : f32
    %58 = vector.broadcast %57 : f32 to vector<1x1xf32>
    %c0_19 = arith.constant 0 : index
    %c0_20 = arith.constant 0 : index
    %59 = vector.load %arg3[%c0_19, %c0_20] : memref<1x1xf32, #tpu.memory_space<vmem>>, vector<1x1xf32>
    tpu.vector_store %arg3[%c0_19, %c0_20], %58 {strides = array<i32>} : memref<1x1xf32, #tpu.memory_space<vmem>>, vector<1x1xf32>,
    return
  }
}

</mosaic_0001>

<bundles_post_ra>
// kernel: tpu_custom_call.1
= control target key start
LH: loop header
LB: loop body
LE: loop exit
PB: predicated region body
PF: predicated region fallthrough
CT: control target
= control target key end

     0   :  { %s502_s0 = inlined_call_operand.vmem [shape: f32[8,256], index: 0, kind: input, shape index: {}]   ;;  %s503_s1 = inlined_call_operand.vmem [shape: f32[8,256], index: 1, kind: input, shape index: {}]   ;;  %s504_s2 = inlined_call_operand.vmem [shape: f32[256,36], index: 2, kind: input, shape index: {}]   ;;  %s505_s3 = inlined_call_operand.hbm [shape: f32[1,1], index: 3, kind: output, shape index: {}]  }
   0x1   :  { %v35_v0 = vld [vmem:[%s504_s2 + $0x80] sm:$0xff]  ;;  %v36_v1 = vld [vmem:[%s504_s2 + $0x88] sm:$0xff]  ;;  %v37_v5 = vld [vmem:[%s504_s2 + $0x90] sm:$0xff] }
   0x2   :  { %v19_v2 = vld [vmem:[%s504_s2] sm:$0xff]  ;;  %v272_v3 = vpack.c.bf16 %v36_v1, %v35_v0  ;;  %v20_v4 = vld [vmem:[%s504_s2 + $0x8] sm:$0xff]  ;;  %v38_v6 = vld [vmem:[%s504_s2 + $0x98] sm:$0xff] }
   0x3   :  { %v274_v7 = vpack.c.bf16 %v20_v4, %v19_v2  ;;  %v276_v8 = vpack.c.bf16 %v38_v6, %v37_v5  ;;  %v21_v9 = vld [vmem:[%s504_s2 + $0x10] sm:$0xff]  ;;  %v22_v10 = vld [vmem:[%s504_s2 + $0x18] sm:$0xff]  ;;  %v39_v11 = vld [vmem:[%s504_s2 + $0xa0] sm:$0xff] }
   0x4   :  { %273 = vmatprep.subr.bf16.mxu0 %v272_v3  ;;  %304 = vmatprep.subr.bf16.mxu1 %v272_v3  ;;  %v40_v12 = vld [vmem:[%s504_s2 + $0xa8] sm:$0xff]  ;;  %v278_v13 = vpack.c.bf16 %v22_v10, %v21_v9  ;;  %v23_v15 = vld [vmem:[%s504_s2 + $0x20] sm:$0xff]  ;;  %v41_v17 = vld [vmem:[%s504_s2 + $0xb0] sm:$0xff] }
   0x5   :  { %275 = vmatpush3.bf16.msra.mxu0 %v274_v7  ;;  %312 = vmatpush3.bf16.msra.mxu1 %v274_v7  ;;  %v280_v14 = vpack.c.bf16 %v40_v12, %v39_v11  ;;  %v24_v16 = vld [vmem:[%s504_s2 + $0x28] sm:$0xff]  ;;  %v42_v18 = vld [vmem:[%s504_s2 + $0xb8] sm:$0xff]  ;;  %v25_v21 = vld [vmem:[%s504_s2 + $0x30] sm:$0xff] }
   0x6   :  { %277 = vmatprep.subr.bf16.mxu0 %v276_v8  ;;  %305 = vmatprep.subr.bf16.mxu1 %v276_v8  ;;  %v282_v19 = vpack.c.bf16 %v24_v16, %v23_v15  ;;  %v284_v20 = vpack.c.bf16 %v42_v18, %v41_v17  ;;  %v26_v22 = vld [vmem:[%s504_s2 + $0x38] sm:$0xff]  ;;  %v43_v23 = vld [vmem:[%s504_s2 + $0xc0] sm:$0xff]  ;;  %v44_v24 = vld [vmem:[%s504_s2 + $0xc8] sm:$0xff] }
   0x7   :  { %v431_v25 = vld [vmem:[%s502_s0] sm:$0xff]  ;;  %v16_v26 = vld [vmem:[%s502_s0 + $0x8] sm:$0xff]  ;;  %v286_v28 = vpack.c.bf16 %v26_v22, %v25_v21 }
   0x8   :  { %v18_v27 = vld [vmem:[%s503_s1 + $0x8] sm:$0xff]  ;;  %v51_v29 = vmax.f32 %v431_v25, %v16_v26 }
   0x9   :  { %279 = vmatpush3.bf16.msra.mxu0 %v278_v13  ;;  %313 = vmatpush3.bf16.msra.mxu1 %v278_v13  ;;  %v83_v30 = vmul.f32 %v18_v27, %v18_v27 }
   0xa   :  { %281 = vmatprep.subr.bf16.mxu0 %v280_v14  ;;  %306 = vmatprep.subr.bf16.mxu1 %v280_v14 }
   0xd   :  { %283 = vmatpush3.bf16.msra.mxu0 %v282_v19  ;;  %314 = vmatpush3.bf16.msra.mxu1 %v282_v19 }
   0xe   :  { %8 = vsyncpa [#allocation3], 0  ;;  %285 = vmatprep.subr.bf16.mxu0 %v284_v20  ;;  %307 = vmatprep.subr.bf16.mxu1 %v284_v20  ;;  %v288_v31 = vpack.c.bf16 %v44_v24, %v43_v23  ;;  %v27_v32 = vld [vmem:[%s504_s2 + $0x40] sm:$0xff]  ;;  %v28_v33 = vld [vmem:[%s504_s2 + $0x48] sm:$0xff]  ;;  %v63_v36 = vmin.f32 %v431_v25, %v16_v26  ;;  %v85_v56 = vmul.f32 %v18_v27, %v16_v26  ;;  %vm196_vm0 = vcmask 293888   ;;  %s353_s8 = smov [#allocation2]  }
   0xf   :  { %v45_v34 = vld [vmem:[%s504_s2 + $0xd0] sm:$0xff]  ;;  %v46_v35 = vld [vmem:[%s504_s2 + $0xd8] sm:$0xff]  ;;  %52 = vmax.xlane.f32.xlu0 %v51_v29  ;;  %150 = vmatprep.mubr.f32.mxu0 %v16_v26  ;;  %v290_v37 = vpack.c.bf16 %v28_v33, %v27_v32  ;;  %v47_v41 = vld [vmem:[%s504_s2 + $0xe0] sm:$0xff]  ;;  %v81_v58 = vmul.f32 %v16_v26, %v16_v26  ;;  %v80_v59 = vmul.f32 %v431_v25, %v431_v25  ;;  %s217_s9 = sshll.u32 %s353_s8, 4  ;;  %vm209_vm1 = vcmask 0   ;;  %s218_s9 = int_to_ptr.vmem [resolvable:$true] %s217_s9 }
  0x10   :  { %165 = vmatprep.mubr.f32.mxu1 %v83_v30  ;;  %v292_v38 = vpack.c.bf16 %v46_v35, %v45_v34  ;;  %v29_v39 = vld [vmem:[%s504_s2 + $0x50] sm:$0xff]  ;;  %v30_v40 = vld [vmem:[%s504_s2 + $0x58] sm:$0xff]  ;;  %v48_v42 = vld [vmem:[%s504_s2 + $0xe8] sm:$0xff]  ;;  %s329_s12 = scalar_lea.vmem %s218_s9, 16  ;;  %s333_s13 = scalar_lea.vmem %s218_s9, 32 }
  0x11   :  { %287 = vmatpush3.bf16.msra.mxu0 %v286_v28  ;;  %315 = vmatpush3.bf16.msra.mxu1 %v286_v28  ;;  %v294_v43 = vpack.c.bf16 %v30_v40, %v29_v39  ;;  %v296_v44 = vpack.c.bf16 %v48_v42, %v47_v41  ;;  %v31_v45 = vld [vmem:[%s504_s2 + $0x60] sm:$0xff]  ;;  %v32_v46 = vld [vmem:[%s504_s2 + $0x68] sm:$0xff]  ;;  %v49_v47 = vld [vmem:[%s504_s2 + $0xf0] sm:$0xff]  ;;  %p330_p2 = scmp.ne.s32.totalorder %s218_s9, %s329_s12  ;;  %p334_p3 = scmp.lt.s32.totalorder %s218_s9, %s218_s9 }
  0x12   :  { %289 = vmatprep.subr.bf16.mxu0 %v288_v31  ;;  %308 = vmatprep.subr.bf16.mxu1 %v288_v31  ;;  %v50_v48 = vld [vmem:[%s504_s2 + $0xf8] sm:$0xff]  ;;  %v298_v49 = vpack.c.bf16 %v32_v46, %v31_v45  ;;  %v33_v51 = vld [vmem:[%s504_s2 + $0x70] sm:$0xff]  ;;  %v17_v54 = vld [vmem:[%s503_s1] sm:$0xff]  ;;  %p335_p4 = scmp.lt.s32.totalorder %s333_s13, %s329_s12 }
  0x13   :  { %64 = vmin.xlane.f32.xlu0 %v63_v36  ;;  %v300_v50 = vpack.c.bf16 %v50_v48, %v49_v47  ;;  %v34_v52 = vld [vmem:[%s504_s2 + $0x78] sm:$0xff]  ;;  %v82_v55 = vmul.f32 %v17_v54, %v17_v54  ;;  %v84_v57 = vmul.f32 %v17_v54, %v431_v25 }
  0x14   :  { %v302_v53 = vpack.c.bf16 %v34_v52, %v33_v51  ;;  %p336_p5 = por %p335_p4, %p334_p3 }
  0x15   :  { %291 = vmatpush3.bf16.msra.mxu0 %v290_v37  ;;  %316 = vmatpush3.bf16.msra.mxu1 %v290_v37 }
  0x16   :  { %293 = vmatprep.subr.bf16.mxu0 %v292_v38  ;;  %309 = vmatprep.subr.bf16.mxu1 %v292_v38  ;;  %p337_p6 = pnand %p336_p5, %p330_p2 }
  0x19   :  { %295 = vmatpush3.bf16.msra.mxu0 %v294_v43  ;;  %317 = vmatpush3.bf16.msra.mxu1 %v294_v43 }
  0x1a   :  { %297 = vmatprep.subr.bf16.mxu0 %v296_v44  ;;  %310 = vmatprep.subr.bf16.mxu1 %v296_v44 }
  0x1d   :  { %299 = vmatpush3.bf16.msra.mxu0 %v298_v49  ;;  %318 = vmatpush3.bf16.msra.mxu1 %v298_v49 }
  0x1e   :  { %301 = vmatprep.subr.bf16.mxu0 %v300_v50  ;;  %311 = vmatprep.subr.bf16.mxu1 %v300_v50 }
  0x21   :  { %303 = vmatpush3.bf16.msra.mxu0 %v302_v53  ;;  %319 = vmatpush3.bf16.msra.mxu1 %v302_v53 }
  0x24   :  { %151 = vmatmul.mubr.f32.vlgmr.msra.gmra.mrb[0].mxu0 %v431_v25  ;;  %166 = vmatmul.mubr.f32.vlgmr.msra.gmra.mrb[0].mxu1 %v82_v55 }
  0x25   :  { %155 = vmatprep.mubr.f32.mxu0 %v18_v27  ;;  %170 = vmatprep.mubr.f32.mxu1 %v85_v56 }
  0x28   :  { %156 = vmatmul.mubr.f32.gmra.mrb[2].mxu0 %v17_v54  ;;  %171 = vmatmul.mubr.f32.gmra.mrb[2].mxu1 %v84_v57 }
  0x29   :  { %160 = vmatprep.mubr.f32.mxu0 %v81_v58 }
  0x2c   :  { %161 = vmatmul.mubr.f32.gmra.mrb[4].mxu0 %v80_v59 }
  0x9c   :  { %v53_v60 = vpop.xlane.xlu0 %52 }
  0x9d   :  { %v54_v61 = vrot.slane %v53_v60, 4 }
  0x9f   :  { %v55_v62 = vmax.f32 %v53_v60, %v54_v61 }
  0xa0   :  { %v65_v63 = vpop.xlane.xlu0 %64 }
  0xa1   :  { %v56_v0 = vrot.slane %v55_v62, 2  ;;  %v66_v1 = vrot.slane %v65_v63, 4 }
  0xa3   :  { %v67_v2 = vmin.f32 %v65_v63, %v66_v1  ;;  %v57_v3 = vmax.f32 %v55_v62, %v56_v0 }
  0xa5   :  { %v68_v4 = vrot.slane %v67_v2, 2  ;;  %v58_v5 = vrot.slane %v57_v3, 1 }
  0xa7   :  { %v69_v6 = vmin.f32 %v67_v2, %v68_v4  ;;  %v59_v7 = vmax.f32 %v57_v3, %v58_v5 }
  0xa9   :  { %320 = vpush %v59_v7  ;;  %v70_v8 = vrot.slane %v69_v6, 1 }
  0xab   :  { %v71_v9 = vmin.f32 %v69_v6, %v70_v8 }
  0xad   :  { %322 = vpush %v71_v9 }
  0xda   :  { %s321_s1 = spop %320 }
  0xdb   :  { %p61_p0 = scmp.gt.f32.partialorder %s321_s1, 128.0 }
  0xdd   :  { %s62_s29 = scalar_select %p61_p0, 255.0, 1.0 }
  0xde   :  { %s323_s2 = spop %322 }
  0xdf   :  { %p73_p1 = scmp.lt.f32.partialorder %s323_s2, -0.5 }
  0xe1   :  { %s74_s0 = scalar_select %p73_p1, -1.0, 0.0 }
  0xe3   :  { %s75_s30 = ssub.f32 %s62_s29, %s74_s0 }
  0xe5   :  { %s76_s4 = smul.f32 0.01, %s75_s30 }
  0xe6   :  { %s78_s5 = smul.f32 0.03, %s75_s30 }
  0xe7   :  { %s77_s6 = smul.f32 %s76_s4, %s76_s4 }
  0xe8   :  { %s79_s7 = smul.f32 %s78_s5, %s78_s5 }
  0xe9   :  { %v188_v33 = vstv %s77_s6 }
  0xea   :  { %v183_v34 = vstv %s79_s7 }
  0xf7   :  { %v257_v10 = vpop.f32.mrb[0].mxu0  ;;  %v266_v11 = vpop.f32.mrb[0].mxu1 }
  0xf8   :  { %v258_v12 = vpop.f32.mrb[1].mxu0  ;;  %v267_v13 = vpop.f32.mrb[1].mxu1 }
  0xf9   :  { %v259_v14 = vadd.f32 %v258_v12, %v257_v10  ;;  %v268_v15 = vadd.f32 %v267_v13, %v266_v11 }
  0xfb   :  { %v260_v16 = vpop.f32.mrb[2].mxu0  ;;  %v269_v17 = vpop.f32.mrb[2].mxu1  ;;  %v176_v22 = vmul.f32 %v259_v14, %v259_v14 }
  0xfc   :  { %v261_v18 = vpop.f32.mrb[3].mxu0  ;;  %v270_v19 = vpop.f32.mrb[3].mxu1 }
  0xfd   :  { %v262_v20 = vadd.f32 %v261_v18, %v260_v16  ;;  %v271_v21 = vadd.f32 %v270_v19, %v269_v17 }
  0xff   :  { %v177_v23 = vmul.f32 %v262_v20, %v262_v20  ;;  %v178_v24 = vmul.f32 %v262_v20, %v259_v14  ;;  %v263_v25 = vpop.f32.mrb[4].mxu0 }
 0x100   :  { %v264_v26 = vpop.f32.mrb[5].mxu0 }
 0x101   :  { %v187_v27 = vmul.f32 2.0, %v178_v24  ;;  %v191_v28 = vadd.f32 %v177_v23, %v176_v22  ;;  %v180_v29 = vsub.f32 %v268_v15, %v177_v23  ;;  %v181_v30 = vsub.f32 %v271_v21, %v178_v24 }
 0x102   :  { %v265_v31 = vadd.f32 %v264_v26, %v263_v25 }
 0x103   :  { %v182_v32 = vmul.f32 2.0, %v181_v30  ;;  %v189_v37 = vadd.f32 %v188_v33, %v187_v27  ;;  %v192_v40 = vadd.f32 %v191_v28, %v188_v33 }
 0x104   :  { %v179_v35 = vsub.f32 %v265_v31, %v176_v22 }
 0x105   :  { %v184_v36 = vadd.f32 %v183_v34, %v182_v32 }
 0x106   :  { %v185_v38 = vadd.f32 %v180_v29, %v179_v35 }
 0x107   :  { %v190_v39 = vmul.f32 %v189_v37, %v184_v36 }
 0x108   :  { %v186_v41 = vadd.f32 %v185_v38, %v183_v34 }
 0x10a   :  { %v193_v42 = vmul.f32 %v192_v40, %v186_v41 }
 0x10c   :  { %327 = vrcp.f32 %v193_v42 }
 0x116   :  { %v328_v43 = vpop.eup %327 }
 0x117   :  { %v195_v44 = vmul.f32 %v328_v43, %v190_v39 }
 0x119   :  { %v197_v45 = vsel %vm196_vm0, %v195_v44, 0.0 }
 0x11a   :  { %198 = vadd.xlane.f32.xlu1 %v197_v45 }
 0x1a7   :  { %v199_v46 = vpop.xlane.xlu1 %198 }
 0x1a8   :  { %v200_v47 = vrot.slane %v199_v46, 4 }
 0x1aa   :  { %v201_v48 = vadd.f32 %v200_v47, %v199_v46 }
 0x1ac   :  { %v202_v49 = vrot.slane %v201_v48, 2 }
 0x1ae   :  { %v203_v50 = vadd.f32 %v202_v49, %v201_v48 }
 0x1b0   :  { %v204_v51 = vrot.slane %v203_v50, 1 }
 0x1b2   :  { %v205_v52 = vadd.f32 %v204_v51, %v203_v50 }
 0x1b4   :  { %324 = vpush %v205_v52 }
 0x1e5   :  { %s325_s10 = spop %324 }
 0x1e6   :  { %s207_s11 = smul.f32 0.0034722222, %s325_s10 }
 0x1e8   :  { %v208_v53 = vstv %s207_s11 }
 0x1e9   :  { %210 = vst.msk [vmem:[#allocation2] sm:$0x1] %vm209_vm1, %v208_v53 }
 0x1ea   :  { %340 = shalt.err (!%p337_p6)
}
 0x1eb   :  { %s341_s16 = scalar_lea.hbm %s505_s3, 16 }
 0x1ec   :  { %p342_p7 = scmp.ne.s32.totalorder %s505_s3, %s341_s16  ;;  %p345_p8 = scmp.lt.u32.totalorder %s341_s16, %s505_s3 }
 0x1ee   :  { %p347_p9 = pnand %p345_p8, %p342_p7 }
 0x1f0   :  { %350 = shalt.err (!%p347_p9)
}
 0x1f1   :  { %220 = dma.vmem_to_hbm [thread:$0]  %s218_s9, 16, %s505_s3, [#allocation3]  }
 0x1f2   :  { %351 = dma.done.wait [#allocation3], 16  }
 0x1f3   :  { %352 = vsyncadd [#allocation3], 4294967280 }
 0x1f4   :  { %224 = vsyncpa [#allocation3], 1 }

</bundles_post_ra>
